<compile_context>
chip_gen: v5e
topology: v5e:2x2
jax: 0.10.0
libtpu: 0.0.40
codegen_flags: <defaults>
</compile_context>

<pallas_src>
import math
import functools

import jax
import jax.numpy as jnp
from jax import lax
from jax.experimental import pallas as pl
from jax.experimental.pallas import tpu as pltpu


# ---------------------------------------------------------------------------
# Small in-kernel helpers (f32 math)
# ---------------------------------------------------------------------------
def _layer_norm(x, gamma, beta, eps):
    mu = jnp.mean(x, axis=-1, keepdims=True)
    var = jnp.mean((x - mu) ** 2, axis=-1, keepdims=True)
    return (x - mu) * lax.rsqrt(var + eps) * gamma + beta


def _erf_poly(x):
    # Abramowitz & Stegun 7.1.26, |error| <= 1.5e-7.  Built from exp/mul/add
    # only so it is guaranteed to lower in Pallas TPU (exp goes to the EUP).
    p = 0.3275911
    a1, a2, a3, a4, a5 = (0.254829592, -0.284496736, 1.421413741,
                          -1.453152027, 1.061405429)
    ax = jnp.abs(x)
    t = 1.0 / (1.0 + p * ax)
    poly = ((((a5 * t + a4) * t + a3) * t + a2) * t + a1) * t
    y = 1.0 - poly * jnp.exp(-(ax * ax))
    return jnp.where(x < 0.0, -y, y)


def _gelu(x):
    # Matches the reference gelu: x * 0.5 * (1 + erf(x / sqrt(2))).
    return x * 0.5 * (1.0 + _erf_poly(x * (1.0 / math.sqrt(2.0))))


def _pick_q_tile(seq_len, target):
    """Largest divisor of seq_len that is a multiple of 8 and <= target."""
    if seq_len <= target:
        return seq_len
    for t in range((target // 8) * 8, 7, -8):
        if seq_len % t == 0:
            return t
    return seq_len


# ---------------------------------------------------------------------------
# Kernel A: self-attention + RobertaSelfOutput (dense + residual + LayerNorm)
# ---------------------------------------------------------------------------
def _attn_kernel(x_ref, m_ref,
                 wq_ref, bq_ref, wk_ref, bk_ref, wv_ref, bv_ref,
                 wao_ref, bao_ref, g1_ref, be1_ref,
                 out_ref, acc_ref,
                 *, q_tile, num_heads, head_size, ln_eps):
    bf16 = jnp.bfloat16
    q0 = pl.multiple_of(pl.program_id(1) * q_tile, q_tile)

    x_all = x_ref[0]                          # (S, H)  f32 : K/V source
    xq = x_ref[0, pl.ds(q0, q_tile), :]       # (tq, H) f32 : Q source + residual
    xk_b = x_all.astype(bf16)
    xq_b = xq.astype(bf16)
    mask = m_ref[0]                           # (1, S) additive attention mask
    scale = 1.0 / math.sqrt(head_size)

    acc_ref[...] = jnp.zeros_like(acc_ref)    # (tq, H) f32 accumulator

    def head_body(h, carry):
        # Per-head weight slabs: full-lane (H, hd) / (hd, H) views via a
        # dynamic leading-axis index.  No lane slicing at head_size width.
        q = jnp.dot(xq_b, wq_ref[h], preferred_element_type=jnp.float32) + bq_ref[h]
        q = (q * scale).astype(bf16)                               # (tq, hd)
        k = (jnp.dot(xk_b, wk_ref[h], preferred_element_type=jnp.float32)
             + bk_ref[h]).astype(bf16)                             # (S, hd)
        v = (jnp.dot(xk_b, wv_ref[h], preferred_element_type=jnp.float32)
             + bv_ref[h]).astype(bf16)                             # (S, hd)

        # q @ k^T via dot_general (contract last dims) -> no XLU transpose.
        s = lax.dot_general(q, k, (((1,), (1,)), ((), ())),
                            preferred_element_type=jnp.float32)    # (tq, S)
        s = s + mask
        s = s - jnp.max(s, axis=-1, keepdims=True)
        p = jnp.exp(s)                                             # f32 softmax
        p = p * pl.reciprocal(jnp.sum(p, axis=-1, keepdims=True), approx=True)

        ctx = jnp.dot(p.astype(bf16), v,
                      preferred_element_type=jnp.float32)          # (tq, hd)
        # Distribute the attention-output projection over heads: accumulate
        # ctx_h @ Wao_h directly -> no head concatenation needed.
        acc_ref[...] += jnp.dot(ctx.astype(bf16), wao_ref[h],
                                preferred_element_type=jnp.float32)  # (tq, H)
        return carry

    lax.fori_loop(0, num_heads, head_body, 0)

    attn_dense = acc_ref[...] + bao_ref[...]
    out_ref[0] = _layer_norm(attn_dense + xq, g1_ref[...], be1_ref[...],
                             ln_eps).astype(out_ref.dtype)


# ---------------------------------------------------------------------------
# Kernel B: RobertaIntermediate (GELU) + RobertaOutput (dense + residual + LN)
# ---------------------------------------------------------------------------
def _ffn_kernel(a_ref, wi_ref, bi_ref, wo_ref, bo_ref, g2_ref, be2_ref,
                out_ref, *, ln_eps):
    bf16 = jnp.bfloat16
    a = a_ref[0]                                               # (tq, H) f32
    inter = jnp.dot(a.astype(bf16), wi_ref[...],
                    preferred_element_type=jnp.float32) + bi_ref[...]
    inter = _gelu(inter)                                       # f32 GELU (erf)
    ffn = jnp.dot(inter.astype(bf16), wo_ref[...],
                  preferred_element_type=jnp.float32) + bo_ref[...]
    out_ref[0] = _layer_norm(ffn + a, g2_ref[...], be2_ref[...],
                             ln_eps).astype(out_ref.dtype)


# ---------------------------------------------------------------------------
# Wrapper
# ---------------------------------------------------------------------------
def roberta_layer(x, attn_mask, params, *, num_heads, head_size, ln_eps=1e-12,
                  q_tile=256, vmem_limit_bytes=None):
    orig_dtype = x.dtype
    B, S, H = x.shape
    I = params["wi"].shape[1]
    assert H == num_heads * head_size

    f32, bf16 = jnp.float32, jnp.bfloat16
    x32 = x.astype(f32)
    mask32 = attn_mask.astype(f32)

    tq = _pick_q_tile(S, q_tile)
    n_qt = S // tq

    # One-time (outside-kernel) re-layout of attention weights to head-major
    # slabs; MXU operands pre-cast to bf16 (halves VMEM residency + HBM DMA).
    def heads_out(w):   # (H, H) -> (nh, H, hd): split the output features
        return w.reshape(H, num_heads, head_size).transpose(1, 0, 2).astype(bf16)

    def heads_bias(b):  # (1, H) -> (nh, 1, hd)
        return b.reshape(num_heads, head_size)[:, None, :].astype(f32)

    wq3, wk3, wv3 = (heads_out(params["wq"]), heads_out(params["wk"]),
                     heads_out(params["wv"]))
    bq3, bk3, bv3 = (heads_bias(params["bq"]), heads_bias(params["bk"]),
                     heads_bias(params["bv"]))
    wao3 = params["wao"].reshape(num_heads, head_size, H).astype(bf16)

    bao = params["bao"].astype(f32)
    g1, be1 = params["g1"].astype(f32), params["be1"].astype(f32)
    wi, bi = params["wi"].astype(bf16), params["bi"].astype(f32)
    wo, bo = params["wo"].astype(bf16), params["bo"].astype(f32)
    g2, be2 = params["g2"].astype(f32), params["be2"].astype(f32)

    # For BERT-base-class shapes on v6e pass e.g. vmem_limit_bytes=96<<20; the
    # bf16 weights + two-kernel split keep realistic configs under the default
    # scoped limit, so None is safe for small/medium shapes.
    cparams = pltpu.CompilerParams(
        dimension_semantics=("parallel", "parallel"),
        vmem_limit_bytes=vmem_limit_bytes)

    def const(shape):
        return pl.BlockSpec(shape, lambda b, q: (0,) * len(shape))

    attn_out = pl.pallas_call(
        functools.partial(_attn_kernel, q_tile=tq, num_heads=num_heads,
                          head_size=head_size, ln_eps=ln_eps),
        out_shape=jax.ShapeDtypeStruct((B, S, H), f32),
        grid=(B, n_qt),
        in_specs=[
            pl.BlockSpec((1, S, H), lambda b, q: (b, 0, 0)),    # hidden_states
            pl.BlockSpec((1, 1, S), lambda b, q: (b, 0, 0)),    # additive mask
            const((num_heads, H, head_size)), const((num_heads, 1, head_size)),  # Wq,bq
            const((num_heads, H, head_size)), const((num_heads, 1, head_size)),  # Wk,bk
            const((num_heads, H, head_size)), const((num_heads, 1, head_size)),  # Wv,bv
            const((num_heads, head_size, H)), const((1, H)),                     # Wao,bao
            const((1, H)), const((1, H)),                                        # LN1
        ],
        out_specs=pl.BlockSpec((1, tq, H), lambda b, q: (b, q, 0)),
        scratch_shapes=[pltpu.VMEM((tq, H), jnp.float32)],
        compiler_params=cparams,
    )(x32, mask32, wq3, bq3, wk3, bk3, wv3, bv3, wao3, bao, g1, be1)

    out = pl.pallas_call(
        functools.partial(_ffn_kernel, ln_eps=ln_eps),
        out_shape=jax.ShapeDtypeStruct((B, S, H), orig_dtype),
        grid=(B, n_qt),
        in_specs=[
            pl.BlockSpec((1, tq, H), lambda b, q: (b, q, 0)),   # attention output
            const((H, I)), const((1, I)),                       # intermediate dense
            const((I, H)), const((1, H)),                       # output dense
            const((1, H)), const((1, H)),                       # LN2
        ],
        out_specs=pl.BlockSpec((1, tq, H), lambda b, q: (b, q, 0)),
        compiler_params=cparams,
    )(attn_out, wi, bi, wo, bo, g2, be2)

    return out


# ---------------------------------------------------------------------------
# Pure-JAX reference mirroring the PyTorch forward (eval mode, f32 math)
# ---------------------------------------------------------------------------
def roberta_layer_reference(x, attn_mask, params, *, num_heads, head_size,
                            ln_eps=1e-12):
    B, S, H = x.shape

    def ln(y, g, b):
        mu = jnp.mean(y, axis=-1, keepdims=True)
        var = jnp.mean((y - mu) ** 2, axis=-1, keepdims=True)
        return (y - mu) * lax.rsqrt(var + ln_eps) * g + b

    q = x @ params["wq"] + params["bq"]
    k = x @ params["wk"] + params["bk"]
    v = x @ params["wv"] + params["bv"]

    def split(t):  # (B,S,H) -> (B,nh,S,hd)
        return t.reshape(B, S, num_heads, head_size).transpose(0, 2, 1, 3)

    qh, kh, vh = split(q), split(k), split(v)
    scores = jnp.einsum("bhqd,bhkd->bhqk", qh, kh) / math.sqrt(head_size)
    scores = scores + attn_mask[:, :, None, :]            # (B,1,1,S) broadcast
    probs = jax.nn.softmax(scores, axis=-1)
    ctx = jnp.einsum("bhqk,bhkd->bhqd", probs, vh)
    ctx = ctx.transpose(0, 2, 1, 3).reshape(B, S, H)

    attn_out = ln(ctx @ params["wao"] + params["bao"] + x,
                  params["g1"], params["be1"])
    inter = attn_out @ params["wi"] + params["bi"]
    inter = inter * 0.5 * (1.0 + lax.erf(inter / math.sqrt(2.0)))
    out = ln(inter @ params["wo"] + params["bo"] + attn_out,
             params["g2"], params["be2"])
    return out


if __name__ == "__main__":
    # Small Roberta-like config.
    B, S, H = 2, 8, 32
    num_heads, head_size = 4, 8
    I = 64
    dtype = jnp.float32

    key = jax.random.PRNGKey(0)
    ks = jax.random.split(key, 16)
    n = lambda k, shape, s=0.02: (s * jax.random.normal(k, shape)).astype(dtype)

    params = {
        # Linear weights stored as (in, out) == torch_weight.T
        "wq": n(ks[0], (H, H)), "bq": n(ks[1], (1, H)),
        "wk": n(ks[2], (H, H)), "bk": n(ks[3], (1, H)),
        "wv": n(ks[4], (H, H)), "bv": n(ks[5], (1, H)),
        "wao": n(ks[6], (H, H)), "bao": n(ks[7], (1, H)),
        "g1": (1.0 + 0.01 * jax.random.normal(ks[8], (1, H))).astype(dtype),
        "be1": n(ks[9], (1, H)),
        "wi": n(ks[10], (H, I)), "bi": n(ks[11], (1, I)),
        "wo": n(ks[12], (I, H)), "bo": n(ks[13], (1, H)),
        "g2": (1.0 + 0.01 * jax.random.normal(ks[14], (1, H))).astype(dtype),
        "be2": n(ks[15], (1, H)),
    }

    xk, mk = jax.random.split(jax.random.PRNGKey(1))
    x = jax.random.normal(xk, (B, S, H), dtype=dtype)
    # Additive attention mask (B,1,S): mask out last 2 key positions of batch 1.
    valid = jnp.ones((B, S), dtype=dtype).at[1, -2:].set(0.0)
    attn_mask = ((1.0 - valid) * -10000.0)[:, None, :].astype(dtype)

    out = roberta_layer(x, attn_mask, params,
                        num_heads=num_heads, head_size=head_size)
    out = jax.block_until_ready(out)

    ref = roberta_layer_reference(x, attn_mask, params,
                                  num_heads=num_heads, head_size=head_size)
    assert out.shape == (B, S, H)
    max_err = jnp.max(jnp.abs(out.astype(jnp.float32) - ref))
    # bf16 MXU operands + approx reciprocal + polynomial erf -> loosened
    # tolerance vs the f32 reference.
    assert jnp.allclose(out.astype(jnp.float32), ref, atol=2e-2, rtol=2e-2), \
        f"max abs err {max_err}"

    print("KERNEL_OK")
</pallas_src>

<mosaic_0001>
module attributes {stable_mosaic.version = 11 : i64} {
  func.func @_attn_kernel(%arg0: i32, %arg1: i32, %arg2: memref<1x8x32xf32, #tpu.memory_space<vmem>>, %arg3: memref<1x1x8xf32, #tpu.memory_space<vmem>>, %arg4: memref<4x32x8xbf16, #tpu.memory_space<vmem>>, %arg5: memref<4x1x8xf32, #tpu.memory_space<vmem>>, %arg6: memref<4x32x8xbf16, #tpu.memory_space<vmem>>, %arg7: memref<4x1x8xf32, #tpu.memory_space<vmem>>, %arg8: memref<4x32x8xbf16, #tpu.memory_space<vmem>>, %arg9: memref<4x1x8xf32, #tpu.memory_space<vmem>>, %arg10: memref<4x8x32xbf16, #tpu.memory_space<vmem>>, %arg11: memref<1x32xf32, #tpu.memory_space<vmem>>, %arg12: memref<1x32xf32, #tpu.memory_space<vmem>>, %arg13: memref<1x32xf32, #tpu.memory_space<vmem>>, %arg14: memref<1x8x32xf32, #tpu.memory_space<vmem>>, %arg15: memref<8x32xf32, #tpu.memory_space<vmem>>) attributes {dimension_semantics = [#tpu.dimension_semantics<parallel>, #tpu.dimension_semantics<parallel>], iteration_bounds = array<i64: 2, 1>, scalar_prefetch = 0 : i64, scratch_operands = 1 : i64, tpu.core_type = #tpu.core_type<tc>, window_params = [{transform_indices = @transform_0, window_bounds = array<i64: 1, 8, 32>}, {transform_indices = @transform_1, window_bounds = array<i64: 1, 1, 8>}, {pipeline_mode = #tpu.pipeline_mode<synchronous>, transform_indices = @transform_2, window_bounds = array<i64: 4, 32, 8>}, {pipeline_mode = #tpu.pipeline_mode<synchronous>, transform_indices = @transform_3, window_bounds = array<i64: 4, 1, 8>}, {pipeline_mode = #tpu.pipeline_mode<synchronous>, transform_indices = @transform_4, window_bounds = array<i64: 4, 32, 8>}, {pipeline_mode = #tpu.pipeline_mode<synchronous>, transform_indices = @transform_5, window_bounds = array<i64: 4, 1, 8>}, {pipeline_mode = #tpu.pipeline_mode<synchronous>, transform_indices = @transform_6, window_bounds = array<i64: 4, 32, 8>}, {pipeline_mode = #tpu.pipeline_mode<synchronous>, transform_indices = @transform_7, window_bounds = array<i64: 4, 1, 8>}, {pipeline_mode = #tpu.pipeline_mode<synchronous>, transform_indices = @transform_8, window_bounds = array<i64: 4, 8, 32>}, {pipeline_mode = #tpu.pipeline_mode<synchronous>, transform_indices = @transform_9, window_bounds = array<i64: 1, 32>}, {pipeline_mode = #tpu.pipeline_mode<synchronous>, transform_indices = @transform_10, window_bounds = array<i64: 1, 32>}, {pipeline_mode = #tpu.pipeline_mode<synchronous>, transform_indices = @transform_11, window_bounds = array<i64: 1, 32>}, {transform_indices = @transform_12, window_bounds = array<i64: 1, 8, 32>}]} {
    %c8_i32 = arith.constant 8 : i32
    %0 = arith.muli %arg1, %c8_i32 : i32
    %1 = tpu.assume_multiple %0, 8 : i32
    %c0 = arith.constant 0 : index
    %c0_0 = arith.constant 0 : index
    %c0_1 = arith.constant 0 : index
    %2 = vector.load %arg2[%c0, %c0_0, %c0_1] : memref<1x8x32xf32, #tpu.memory_space<vmem>>, vector<1x8x32xf32>
    %3 = vector.shape_cast %2 : vector<1x8x32xf32> to vector<8x32xf32>
    %c0_2 = arith.constant 0 : index
    %4 = arith.index_cast %1 : i32 to index
    %c0_3 = arith.constant 0 : index
    %5 = vector.load %arg2[%c0_2, %4, %c0_3] : memref<1x8x32xf32, #tpu.memory_space<vmem>>, vector<1x8x32xf32>
    %6 = vector.shape_cast %5 : vector<1x8x32xf32> to vector<8x32xf32>
    %7 = arith.truncf %3 : vector<8x32xf32> to vector<8x32xbf16>
    %8 = arith.truncf %6 : vector<8x32xf32> to vector<8x32xbf16>
    %c0_4 = arith.constant 0 : index
    %c0_5 = arith.constant 0 : index
    %c0_6 = arith.constant 0 : index
    %9 = vector.load %arg3[%c0_4, %c0_5, %c0_6] : memref<1x1x8xf32, #tpu.memory_space<vmem>>, vector<1x1x8xf32>
    %10 = vector.shape_cast %9 : vector<1x1x8xf32> to vector<1x8xf32>
    %cst = arith.constant 0.000000e+00 : f32
    %11 = vector.broadcast %cst : f32 to vector<8x32xf32>
    %c0_7 = arith.constant 0 : index
    %c0_8 = arith.constant 0 : index
    %12 = vector.load %arg15[%c0_7, %c0_8] : memref<8x32xf32, #tpu.memory_space<vmem>>, vector<8x32xf32>
    tpu.vector_store %arg15[%c0_7, %c0_8], %11 {strides = array<i32>} : memref<8x32xf32, #tpu.memory_space<vmem>>, vector<8x32xf32>,
    %c0_i32 = arith.constant 0 : i32
    %c4_i32 = arith.constant 4 : i32
    %13 = arith.addi %c0_i32, %c4_i32 : i32
    %c1_i32 = arith.constant 1 : i32
    scf.for %arg16 = %c0_i32 to %13 step %c1_i32  : i32 {
      %46 = arith.index_cast %arg16 : i32 to index
      %c0_26 = arith.constant 0 : index
      %c0_27 = arith.constant 0 : index
      %47 = vector.load %arg4[%46, %c0_26, %c0_27] : memref<4x32x8xbf16, #tpu.memory_space<vmem>>, vector<1x32x8xbf16>
      %48 = vector.shape_cast %47 : vector<1x32x8xbf16> to vector<32x8xbf16>
      %cst_28 = arith.constant dense<0.000000e+00> : vector<8x8xf32>
      %49 = tpu.matmul %8, %48, %cst_28 {dimension_numbers = #tpu.dot_dimension_numbers<[1], [0], [0], [1], [0, 0, 1, 1], [], []>} : vector<8x32xbf16>, vector<32x8xbf16>, vector<8x8xf32> -> vector<8x8xf32>
      %50 = arith.index_cast %arg16 : i32 to index
      %c0_29 = arith.constant 0 : index
      %c0_30 = arith.constant 0 : index
      %51 = vector.load %arg5[%50, %c0_29, %c0_30] : memref<4x1x8xf32, #tpu.memory_space<vmem>>, vector<1x1x8xf32>
      %52 = vector.shape_cast %51 : vector<1x1x8xf32> to vector<1x8xf32>
      %53 = vector.broadcast %52 : vector<1x8xf32> to vector<8x8xf32>
      %54 = arith.addf %49, %53 : vector<8x8xf32>
      %cst_31 = arith.constant 0.353553385 : f32
      %55 = vector.broadcast %cst_31 : f32 to vector<8x8xf32>
      %56 = arith.mulf %54, %55 : vector<8x8xf32>
      %57 = arith.truncf %56 : vector<8x8xf32> to vector<8x8xbf16>
      %58 = arith.index_cast %arg16 : i32 to index
      %c0_32 = arith.constant 0 : index
      %c0_33 = arith.constant 0 : index
      %59 = vector.load %arg6[%58, %c0_32, %c0_33] : memref<4x32x8xbf16, #tpu.memory_space<vmem>>, vector<1x32x8xbf16>
      %60 = vector.shape_cast %59 : vector<1x32x8xbf16> to vector<32x8xbf16>
      %cst_34 = arith.constant dense<0.000000e+00> : vector<8x8xf32>
      %61 = tpu.matmul %7, %60, %cst_34 {dimension_numbers = #tpu.dot_dimension_numbers<[1], [0], [0], [1], [0, 0, 1, 1], [], []>} : vector<8x32xbf16>, vector<32x8xbf16>, vector<8x8xf32> -> vector<8x8xf32>
      %62 = arith.index_cast %arg16 : i32 to index
      %c0_35 = arith.constant 0 : index
      %c0_36 = arith.constant 0 : index
      %63 = vector.load %arg7[%62, %c0_35, %c0_36] : memref<4x1x8xf32, #tpu.memory_space<vmem>>, vector<1x1x8xf32>
      %64 = vector.shape_cast %63 : vector<1x1x8xf32> to vector<1x8xf32>
      %65 = vector.broadcast %64 : vector<1x8xf32> to vector<8x8xf32>
      %66 = arith.addf %61, %65 : vector<8x8xf32>
      %67 = arith.truncf %66 : vector<8x8xf32> to vector<8x8xbf16>
      %68 = arith.index_cast %arg16 : i32 to index
      %c0_37 = arith.constant 0 : index
      %c0_38 = arith.constant 0 : index
      %69 = vector.load %arg8[%68, %c0_37, %c0_38] : memref<4x32x8xbf16, #tpu.memory_space<vmem>>, vector<1x32x8xbf16>
      %70 = vector.shape_cast %69 : vector<1x32x8xbf16> to vector<32x8xbf16>
      %cst_39 = arith.constant dense<0.000000e+00> : vector<8x8xf32>
      %71 = tpu.matmul %7, %70, %cst_39 {dimension_numbers = #tpu.dot_dimension_numbers<[1], [0], [0], [1], [0, 0, 1, 1], [], []>} : vector<8x32xbf16>, vector<32x8xbf16>, vector<8x8xf32> -> vector<8x8xf32>
      %72 = arith.index_cast %arg16 : i32 to index
      %c0_40 = arith.constant 0 : index
      %c0_41 = arith.constant 0 : index
      %73 = vector.load %arg9[%72, %c0_40, %c0_41] : memref<4x1x8xf32, #tpu.memory_space<vmem>>, vector<1x1x8xf32>
      %74 = vector.shape_cast %73 : vector<1x1x8xf32> to vector<1x8xf32>
      %75 = vector.broadcast %74 : vector<1x8xf32> to vector<8x8xf32>
      %76 = arith.addf %71, %75 : vector<8x8xf32>
      %77 = arith.truncf %76 : vector<8x8xf32> to vector<8x8xbf16>
      %cst_42 = arith.constant dense<0.000000e+00> : vector<8x8xf32>
      %78 = tpu.matmul %57, %67, %cst_42 {dimension_numbers = #tpu.dot_dimension_numbers<[1], [1], [0], [0], [0, 0, 1, 0], [], []>} : vector<8x8xbf16>, vector<8x8xbf16>, vector<8x8xf32> -> vector<8x8xf32>
      %79 = vector.broadcast %10 : vector<1x8xf32> to vector<8x8xf32>
      %80 = arith.addf %78, %79 : vector<8x8xf32>
      %cst_43 = arith.constant dense<0xFF800000> : vector<8xf32>
      %81 = vector.multi_reduction <maximumf>, %80, %cst_43 [1] : vector<8x8xf32> to vector<8xf32>
      %82 = vector.shape_cast %81 : vector<8xf32> to vector<8x1xf32>
      %83 = vector.broadcast %82 : vector<8x1xf32> to vector<8x8xf32>
      %84 = arith.subf %80, %83 : vector<8x8xf32>
      %85 = math.exp %84 : vector<8x8xf32>
      %cst_44 = arith.constant dense<0.000000e+00> : vector<8xf32>
      %86 = vector.multi_reduction <add>, %85, %cst_44 [1] : vector<8x8xf32> to vector<8xf32>
      %87 = vector.shape_cast %86 : vector<8xf32> to vector<8x1xf32>
      %88 = tpu.reciprocal %87 {approx = true} : vector<8x1xf32> -> vector<8x1xf32>
      %89 = vector.broadcast %88 : vector<8x1xf32> to vector<8x8xf32>
      %90 = arith.mulf %85, %89 : vector<8x8xf32>
      %91 = arith.truncf %90 : vector<8x8xf32> to vector<8x8xbf16>
      %cst_45 = arith.constant dense<0.000000e+00> : vector<8x8xf32>
      %92 = tpu.matmul %91, %77, %cst_45 {dimension_numbers = #tpu.dot_dimension_numbers<[1], [0], [0], [1], [0, 0, 1, 1], [], []>} : vector<8x8xbf16>, vector<8x8xbf16>, vector<8x8xf32> -> vector<8x8xf32>
      %c0_46 = arith.constant 0 : index
      %c0_47 = arith.constant 0 : index
      %93 = vector.load %arg15[%c0_46, %c0_47] : memref<8x32xf32, #tpu.memory_space<vmem>>, vector<8x32xf32>
      %94 = arith.truncf %92 : vector<8x8xf32> to vector<8x8xbf16>
      %95 = arith.index_cast %arg16 : i32 to index
      %c0_48 = arith.constant 0 : index
      %c0_49 = arith.constant 0 : index
      %96 = vector.load %arg10[%95, %c0_48, %c0_49] : memref<4x8x32xbf16, #tpu.memory_space<vmem>>, vector<1x8x32xbf16>
      %97 = vector.shape_cast %96 : vector<1x8x32xbf16> to vector<8x32xbf16>
      %cst_50 = arith.constant dense<0.000000e+00> : vector<8x32xf32>
      %98 = tpu.matmul %94, %97, %cst_50 {dimension_numbers = #tpu.dot_dimension_numbers<[1], [0], [0], [1], [0, 0, 1, 1], [], []>} : vector<8x8xbf16>, vector<8x32xbf16>, vector<8x32xf32> -> vector<8x32xf32>
      %99 = arith.addf %93, %98 : vector<8x32xf32>
      %c0_51 = arith.constant 0 : index
      %c0_52 = arith.constant 0 : index
      %100 = vector.load %arg15[%c0_51, %c0_52] : memref<8x32xf32, #tpu.memory_space<vmem>>, vector<8x32xf32>
      tpu.vector_store %arg15[%c0_51, %c0_52], %99 {strides = array<i32>} : memref<8x32xf32, #tpu.memory_space<vmem>>, vector<8x32xf32>,
    }
    %c4_i32_9 = arith.constant 4 : i32
    %c0_10 = arith.constant 0 : index
    %c0_11 = arith.constant 0 : index
    %14 = vector.load %arg15[%c0_10, %c0_11] : memref<8x32xf32, #tpu.memory_space<vmem>>, vector<8x32xf32>
    %c0_12 = arith.constant 0 : index
    %c0_13 = arith.constant 0 : index
    %15 = vector.load %arg11[%c0_12, %c0_13] : memref<1x32xf32, #tpu.memory_space<vmem>>, vector<1x32xf32>
    %16 = vector.broadcast %15 : vector<1x32xf32> to vector<8x32xf32>
    %17 = arith.addf %14, %16 : vector<8x32xf32>
    %18 = arith.addf %17, %6 : vector<8x32xf32>
    %c0_14 = arith.constant 0 : index
    %c0_15 = arith.constant 0 : index
    %19 = vector.load %arg12[%c0_14, %c0_15] : memref<1x32xf32, #tpu.memory_space<vmem>>, vector<1x32xf32>
    %c0_16 = arith.constant 0 : index
    %c0_17 = arith.constant 0 : index
    %20 = vector.load %arg13[%c0_16, %c0_17] : memref<1x32xf32, #tpu.memory_space<vmem>>, vector<1x32xf32>
    %cst_18 = arith.constant dense<0.000000e+00> : vector<8xf32>
    %21 = vector.multi_reduction <add>, %18, %cst_18 [1] : vector<8x32xf32> to vector<8xf32>
    %22 = vector.shape_cast %21 : vector<8xf32> to vector<8x1xf32>
    %cst_19 = arith.constant 3.200000e+01 : f32
    %23 = vector.broadcast %cst_19 : f32 to vector<8x1xf32>
    %24 = arith.divf %22, %23 : vector<8x1xf32>
    %25 = vector.broadcast %24 : vector<8x1xf32> to vector<8x32xf32>
    %26 = arith.subf %18, %25 : vector<8x32xf32>
    %27 = arith.mulf %26, %26 : vector<8x32xf32>
    %cst_20 = arith.constant dense<0.000000e+00> : vector<8xf32>
    %28 = vector.multi_reduction <add>, %27, %cst_20 [1] : vector<8x32xf32> to vector<8xf32>
    %29 = vector.shape_cast %28 : vector<8xf32> to vector<8x1xf32>
    %cst_21 = arith.constant 3.200000e+01 : f32
    %30 = vector.broadcast %cst_21 : f32 to vector<8x1xf32>
    %31 = arith.divf %29, %30 : vector<8x1xf32>
    %32 = vector.broadcast %24 : vector<8x1xf32> to vector<8x32xf32>
    %33 = arith.subf %18, %32 : vector<8x32xf32>
    %cst_22 = arith.constant 9.99999996E-13 : f32
    %34 = vector.broadcast %cst_22 : f32 to vector<8x1xf32>
    %35 = arith.addf %31, %34 : vector<8x1xf32>
    %36 = math.rsqrt %35 : vector<8x1xf32>
    %37 = vector.broadcast %36 : vector<8x1xf32> to vector<8x32xf32>
    %38 = arith.mulf %33, %37 : vector<8x32xf32>
    %39 = vector.broadcast %19 : vector<1x32xf32> to vector<8x32xf32>
    %40 = arith.mulf %38, %39 : vector<8x32xf32>
    %41 = vector.broadcast %20 : vector<1x32xf32> to vector<8x32xf32>
    %42 = arith.addf %40, %41 : vector<8x32xf32>
    %c0_23 = arith.constant 0 : index
    %c0_24 = arith.constant 0 : index
    %c0_25 = arith.constant 0 : index
    %43 = vector.load %arg14[%c0_23, %c0_24, %c0_25] : memref<1x8x32xf32, #tpu.memory_space<vmem>>, vector<1x8x32xf32>
    %44 = vector.shape_cast %43 : vector<1x8x32xf32> to vector<8x32xf32>
    %45 = vector.shape_cast %42 : vector<8x32xf32> to vector<1x8x32xf32>
    tpu.vector_store %arg14[%c0_23, %c0_24, %c0_25], %45 {strides = array<i32>} : memref<1x8x32xf32, #tpu.memory_space<vmem>>, vector<1x8x32xf32>,
    return
  }
  func.func @transform_0(%arg0: i32, %arg1: i32) -> (i32, i32, i32) {
    %c0_i32 = arith.constant 0 : i32
    %c0_i32_0 = arith.constant 0 : i32
    %c0_i32_1 = arith.constant 0 : i32
    return %arg0, %c0_i32, %c0_i32_0 : i32, i32, i32
  }
  func.func @transform_1(%arg0: i32, %arg1: i32) -> (i32, i32, i32) {
    %c0_i32 = arith.constant 0 : i32
    %c0_i32_0 = arith.constant 0 : i32
    %c0_i32_1 = arith.constant 0 : i32
    return %arg0, %c0_i32, %c0_i32_0 : i32, i32, i32
  }
  func.func @transform_2(%arg0: i32, %arg1: i32) -> (i32, i32, i32) {
    %c0_i32 = arith.constant 0 : i32
    %c0_i32_0 = arith.constant 0 : i32
    %c0_i32_1 = arith.constant 0 : i32
    %c0_i32_2 = arith.constant 0 : i32
    return %c0_i32, %c0_i32_0, %c0_i32_1 : i32, i32, i32
  }
  func.func @transform_3(%arg0: i32, %arg1: i32) -> (i32, i32, i32) {
    %c0_i32 = arith.constant 0 : i32
    %c0_i32_0 = arith.constant 0 : i32
    %c0_i32_1 = arith.constant 0 : i32
    %c0_i32_2 = arith.constant 0 : i32
    return %c0_i32, %c0_i32_0, %c0_i32_1 : i32, i32, i32
  }
  func.func @transform_4(%arg0: i32, %arg1: i32) -> (i32, i32, i32) {
    %c0_i32 = arith.constant 0 : i32
    %c0_i32_0 = arith.constant 0 : i32
    %c0_i32_1 = arith.constant 0 : i32
    %c0_i32_2 = arith.constant 0 : i32
    return %c0_i32, %c0_i32_0, %c0_i32_1 : i32, i32, i32
  }
  func.func @transform_5(%arg0: i32, %arg1: i32) -> (i32, i32, i32) {
    %c0_i32 = arith.constant 0 : i32
    %c0_i32_0 = arith.constant 0 : i32
    %c0_i32_1 = arith.constant 0 : i32
    %c0_i32_2 = arith.constant 0 : i32
    return %c0_i32, %c0_i32_0, %c0_i32_1 : i32, i32, i32
  }
  func.func @transform_6(%arg0: i32, %arg1: i32) -> (i32, i32, i32) {
    %c0_i32 = arith.constant 0 : i32
    %c0_i32_0 = arith.constant 0 : i32
    %c0_i32_1 = arith.constant 0 : i32
    %c0_i32_2 = arith.constant 0 : i32
    return %c0_i32, %c0_i32_0, %c0_i32_1 : i32, i32, i32
  }
  func.func @transform_7(%arg0: i32, %arg1: i32) -> (i32, i32, i32) {
    %c0_i32 = arith.constant 0 : i32
    %c0_i32_0 = arith.constant 0 : i32
    %c0_i32_1 = arith.constant 0 : i32
    %c0_i32_2 = arith.constant 0 : i32
    return %c0_i32, %c0_i32_0, %c0_i32_1 : i32, i32, i32
  }
  func.func @transform_8(%arg0: i32, %arg1: i32) -> (i32, i32, i32) {
    %c0_i32 = arith.constant 0 : i32
    %c0_i32_0 = arith.constant 0 : i32
    %c0_i32_1 = arith.constant 0 : i32
    %c0_i32_2 = arith.constant 0 : i32
    return %c0_i32, %c0_i32_0, %c0_i32_1 : i32, i32, i32
  }
  func.func @transform_9(%arg0: i32, %arg1: i32) -> (i32, i32) {
    %c0_i32 = arith.constant 0 : i32
    %c0_i32_0 = arith.constant 0 : i32
    %c0_i32_1 = arith.constant 0 : i32
    return %c0_i32, %c0_i32_0 : i32, i32
  }
  func.func @transform_10(%arg0: i32, %arg1: i32) -> (i32, i32) {
    %c0_i32 = arith.constant 0 : i32
    %c0_i32_0 = arith.constant 0 : i32
    %c0_i32_1 = arith.constant 0 : i32
    return %c0_i32, %c0_i32_0 : i32, i32
  }
  func.func @transform_11(%arg0: i32, %arg1: i32) -> (i32, i32) {
    %c0_i32 = arith.constant 0 : i32
    %c0_i32_0 = arith.constant 0 : i32
    %c0_i32_1 = arith.constant 0 : i32
    return %c0_i32, %c0_i32_0 : i32, i32
  }
  func.func @transform_12(%arg0: i32, %arg1: i32) -> (i32, i32, i32) {
    %c0_i32 = arith.constant 0 : i32
    %c0_i32_0 = arith.constant 0 : i32
    return %arg0, %arg1, %c0_i32 : i32, i32, i32
  }
}

</mosaic_0001>

<bundles_post_ra>
// kernel: tpu_custom_call.1
= control target key start
LH: loop header
LB: loop body
LE: loop exit
PB: predicated region body
PF: predicated region fallthrough
CT: control target
= control target key end

     0   :  { %s1287_s0 = inlined_call_operand.vmem [shape: f32[2,8,32], index: 0, kind: input, shape index: {}]   ;;  %s1288_s1 = inlined_call_operand.vmem [shape: f32[2,1,8], index: 1, kind: input, shape index: {}]   ;;  %s1289_s2 = inlined_call_operand.vmem [shape: bf16[4,32,8], index: 2, kind: input, shape index: {}]   ;;  %s1290_s3 = inlined_call_operand.vmem [shape: f32[4,1,8], index: 3, kind: input, shape index: {}]   ;;  %s1291_s4 = inlined_call_operand.vmem [shape: bf16[4,32,8], index: 4, kind: input, shape index: {}]   ;;  %s1292_s5 = inlined_call_operand.vmem [shape: f32[4,1,8], index: 5, kind: input, shape index: {}]   ;;  %s1293_s6 = inlined_call_operand.vmem [shape: bf16[4,32,8], index: 6, kind: input, shape index: {}]   ;;  %s1294_s7 = inlined_call_operand.vmem [shape: f32[4,1,8], index: 7, kind: input, shape index: {}]   ;;  %s1295_s8 = inlined_call_operand.vmem [shape: bf16[4,8,32], index: 8, kind: input, shape index: {}]   ;;  %s1296_s9 = inlined_call_operand.vmem [shape: f32[1,32], index: 9, kind: input, shape index: {}]   ;;  %s1297_s10 = inlined_call_operand.vmem [shape: f32[1,32], index: 10, kind: input, shape index: {}]   ;;  %s1298_s11 = inlined_call_operand.vmem [shape: f32[1,32], index: 11, kind: input, shape index: {}]   ;;  %s1299_s12 = inlined_call_operand.hbm [shape: f32[2,8,32], index: 12, kind: output, shape index: {}]  }
   0x1   :  { %1304 = sst [smem:[#allocation10_spill]] %s1287_s0 }
   0x2   :  { %1305 = sst [smem:[#allocation11_spill]] %s1288_s1 }
   0x3   :  { %17 = vsyncpa [#allocation4], 0 }
   0x4   :  { %19 = vsyncpa [#allocation4 + $0x1], 0  ;;  %s1101_s21 = smov 0   ;;  %s1103_s22 = smov 0  }
   0x5   :  { %s1105_s23 = smov 0   ;;  %s1107_s24 = smov 0  }
   0x6   :  { %s1109_s25 = smov 0   ;;  %s1111_s26 = smov 0  }
   0x7 LB: > { %1306 = sst [smem:[#allocation6_spill]] %s1016_s23  ;;  %s812_s27 = sadd.s32 4294967295, %s1028_s26   ;;  %s1028_s26 = sphi %s1111_s26, %s25_s26   ;;  %s1024_s25 = sphi %s1109_s25, %s1320_s25   ;;  %s1020_s24 = sphi %s1107_s24, %s1323_s24   ;;  %s1016_s23 = sphi %s1105_s23, %s1318_s23   ;;  %s1012_s22 = sphi %s1103_s22, %s1322_s22   ;;  %s1008_s21 = sphi %s1101_s21, %s1321_s21  }
   0x8   : > { %1307 = sst [smem:[#allocation7_spill]] %s1024_s25  ;;  %s813_s28 = sadd.s32 4294967294, %s1028_s26  }
   0x9   : > { %s37_s29 = sadd.s32 1, %s1024_s25  ;;  %s308_s30 = sadd.s32 1, %s1016_s23 }
   0xa   : > { %p39_p0 = scmp.ge.s32.totalorder %s37_s29, 2  ;;  %p318_p1 = scmp.ne.s32.totalorder %s1016_s23, %s1012_s22 }
   0xb   : > { %p319_p2 = scmp.eq.s32.totalorder %s812_s27, 1  ;;  %p324_p3 = scmp.ne.s32.totalorder %s1012_s22, %s1008_s21 }
   0xc   : > { %s1325_s29 = smov (%p39_p0, %s37_s29), 0  ;;  %p325_p5 = scmp.eq.s32.totalorder %s813_s28, 1 }
   0xd   : > { %1308 = sst [smem:[#allocation8_spill]] %s1325_s29  ;;  %p1141_p4 = por %p319_p2, %p318_p1 }
   0xe   : > { %s303_s14 = ssub.s32 %s1024_s25, %s1325_s29  ;;  %p816_p6 = scmp.ge.s32.totalorder %s1028_s26, 1 }
   0xf   : > { %p306_p7 = scmp.eq.s32.totalorder %s303_s14, 0  ;;  %p1148_p8 = por %p325_p5, %p324_p3 }
  0x10   : > { %p386_p9 = scmp.lt.s32.totalorder %s1028_s26, 3 }
  0x11   : > { %s1154_s16 = scalar_select %p306_p7, %s1016_s23, %s308_s30  }
  0x12   : > { %p387_p10 = pnand %p816_p6, %p386_p9 }
  0x13   : > { %1311 = sst [smem:[#allocation9_spill]] %s1154_s16  ;;  %s1302_s17 = sand.u32 (!%p387_p10), 1, %s1012_s22  }
  0x14   : > { %390 = sbr.rel (%p387_p10) target bundleno = 1109 (0x455), region = 68  ;;  %p430_p11 = scmp.lt.s32.totalorder (!%p387_p10), %s1020_s24, 1 }
  0x15   : > { %s1160_s18 = sshll.u32 (!%p387_p10), %s1302_s17, 3  ;;  %s1312_s1 = sld [smem:[#allocation11_spill]] (!%p387_p10) }
  0x16   : > { %s1313_s0 = sld [smem:[#allocation10_spill]] (!%p387_p10)  ;;  %s1179_s16 = smov (!%p387_p10), 0  }
  0x19   : > { %vm445_vm0 = vcmask 261120   ;;  %v1034_v0 = vmov 0.0   ;;  %s431_s19 = scalar_select %p430_p11, %s1020_s24, 1 }
  0x1a   : > { %446 = vst.msk [vmem:[#allocation2] sm:$0xff] %vm445_vm0, %v1034_v0 }
  0x1b   : > { %s818_s20 = sshll.u32 %s431_s19, 3  ;;  %s436_s30 = scalar_lea.vmem %s1312_s1, %s431_s19 }
  0x1c   : > { %s433_s25 = scalar_lea.vmem %s1313_s0, %s818_s20  ;;  %v1170_v1 = vld [vmem:[%s436_s30] sm:$0x1] }
  0x1d   : > { %v1172_v2 = vld [vmem:[%s433_s25] sm:$0xff] }
  0x1e   : > { %v1176_v3 = vpack.c.bf16 %v1172_v2, %v1172_v2 }
  0x1f LB: >> { %s1185_s29 = sshll.u32 %s1032_s16, 4  ;;  %s460_s20 = scalar_lea.vmem %s1290_s3, %s1032_s16  ;;  %vm575_vm1 = vcmask 64512   ;;  %v573_v22 = vperm.slane %v1170_v1, 0  ;;  %vm610_vm2 = vcmask 1043456   ;;  %s1032_s16 = sphi %s1179_s16, %s452_s16  }
  0x20   : >> { %s455_s30 = scalar_lea.vmem %s1289_s2, %s1185_s29  ;;  %s496_s0 = scalar_lea.vmem %s1291_s4, %s1185_s29  ;;  %v932_v8 = vld [vmem:[%s460_s20] ss:$0 sm:$0xff] }
  0x21   : >> { %v860_v4 = vld [vmem:[%s455_s30 + $0x8] sm:$0xff]  ;;  %v859_v6 = vld [vmem:[%s455_s30] sm:$0xff]  ;;  %s501_s19 = scalar_lea.vmem %s1292_s5, %s1032_s16  ;;  %s536_s23 = scalar_lea.vmem %s1293_s6, %s1185_s29 }
  0x22   : >> { %v863_v5 = vld [vmem:[%s496_s0 + $0x8] sm:$0xff]  ;;  %486 = vmatpush.bf16.msra.mxu0 %v860_v4  ;;  %v862_v7 = vld [vmem:[%s496_s0] sm:$0xff]  ;;  %s541_s20 = scalar_lea.vmem %s1294_s7, %s1032_s16  ;;  %s852_s29 = sshll.u32 %s1032_s16, 2 }
  0x23   : >> { %527 = vmatpush.bf16.msra.mxu1 %v863_v5  ;;  %v933_v9 = vld [vmem:[%s501_s19] ss:$0 sm:$0xff]  ;;  %v866_v20 = vld [vmem:[%s536_s23 + $0x8] sm:$0xff]  ;;  %s630_s30 = scalar_lea.vmem %s1295_s8, %s852_s29  ;;  %s452_s16 = sadd.s32 1, %s1032_s16  }
  0x24   : >> { %564 = vmatpush.bf16.msra.mxu2 %v866_v20  ;;  %v865_v21 = vld [vmem:[%s536_s23] sm:$0xff]  ;;  %p449_p12 = scmp.ge.s32.totalorder %s452_s16, 4  }
  0x25   : >> { %v934_v27 = vld [vmem:[%s541_s20] ss:$0 sm:$0xff]  ;;  %v1035_v56 = vmov (%p449_p12), 32.0   ;;  %s855_s16 = sshll.u32 (%p449_p12), %s1020_s24, 3  ;;  %s1314_s24 = scalar_lea.vmem (%p449_p12), [#allocation3], %s1160_s18 }
  0x26   : >> { %487 = vmatpush.bf16.msra.mxu0 %v859_v6  ;;  %v631_v38 = vld [vmem:[%s630_s30] sm:$0xf]  ;;  %s712_s25 = scalar_lea.hbm (%p449_p12), %s1299_s12, %s855_s16  ;;  %s714_s27 = sshll.u32 (%p449_p12), %s1314_s24, 4  ;;  %s715_s27 = int_to_ptr.vmem [resolvable:$true] %s714_s27 }
  0x27   : >> { %528 = vmatpush.bf16.msra.mxu1 %v862_v7  ;;  %v636_v39 = vsel %vm610_vm2, %v631_v38, 0  ;;  %v627_v47 = vld [vmem:[#allocation2] sm:$0xff]  ;;  %s716_s28 = sshll.u32 (%p449_p12), %s712_s25, 4  ;;  %s1315_s30 = smov (%p449_p12), %s1314_s24  ;;  %s717_s28 = int_to_ptr.hbm [resolvable:$true] %s716_s28 }
  0x28   : >> { %565 = vmatpush.bf16.msra.mxu2 %v865_v21  ;;  %v939_v52 = vld [vmem:[%s1296_s9] ss:$0 sm:$0xff] (%p449_p12)  ;;  %s1316_s14 = sand.u32 (%p449_p12), 1, %s1012_s22   ;;  %s960_s16 = sshra.s32 (%p449_p12), %s717_s28, 4  ;;  %s961_s16 = int_to_ptr.hbm [resolvable:$true] %s960_s16 }
  0x29   : >> { %829 = vmatmul.msk.bf16.vlgmr.msra.gmra.mxu0 %vm445_vm0, %v1176_v3  ;;  %s701_s19 = scalar_lea.sflag (%p449_p12), [#allocation4], %s1316_s14  ;;  %s962_s0 = scalar_lea.hbm (%p449_p12), %s961_s16, 8 }
  0x2a   : >> { %839 = vmatmul.msk.bf16.vlgmr.msra.gmra.mxu1 %vm445_vm0, %v1176_v3  ;;  %p963_p13 = scmp.ne.s32.totalorder (%p449_p12), %s961_s16, %s962_s0  ;;  %s966_s17 = scalar_lea.hbm (%p449_p12), %s1299_s12, 16 }
  0x2b   : >> { %849 = vmatmul.msk.bf16.vlgmr.msra.gmra.mxu2 %vm445_vm0, %v1176_v3  ;;  %645 = vmatpush.bf16.msrb.mxu1 %v636_v39  ;;  %p967_p2 = scmp.lt.s32.totalorder (%p449_p12), %s961_s16, %s1299_s12  ;;  %p968_p3 = scmp.lt.s32.totalorder (%p449_p12), %s966_s17, %s962_s0 }
  0x2c   : > { %p964_p0 = pnand (%p449_p12), %p963_p13, %p1141_p4 }
  0x2d   : > { %p969_p5 = por (%p449_p12), %p968_p3, %p967_p2 }
  0x2e   : > { %p965_p1 = pneg (%p449_p12), %p964_p0 }
  0x30   : > { %p970_p6 = pnand (%p449_p12), %p969_p5, %p965_p1 }
  0xa6   : >> { %v489_v10 = vpop.f32.mrf.mxu0 }
  0xa7   : >> { %v530_v11 = vpop.f32.mrf.mxu1  ;;  %v490_v12 = vadd.f32 %v932_v8, %v489_v10 }
  0xa8   : >> { %v531_v13 = vadd.f32 %v933_v9, %v530_v11 }
  0xa9   : >> { %v493_v15 = vmul.f32 0.35355338, %v490_v12 }
  0xaa   : >> { %v534_v14 = vpack.c.bf16 %v531_v13, %v531_v13  ;;  %v940_v13 = vld [vmem:[%s1297_s10] ss:$0 sm:$0xff] (%p449_p12) }
  0xab   : >> { %v494_v19 = vpack.c.bf16 %v493_v15, %v493_v15 }
  0xac   : >> { %v580_v16 = vsel %vm575_vm1, %v534_v14, 0 }
  0xad   : >> { %589 = vmatpush.bf16.xpose.msra.mxu3 %v580_v16  ;;  %v941_v16 = vld [vmem:[%s1298_s11] ss:$0 sm:$0xff] (%p449_p12) }
  0xae   : >> { %v491_v17 = vpop.f32.mrf.mxu0  ;;  %v567_v28 = vpop.f32.mrf.mxu2 }
  0xaf   : >> { %v532_v18 = vpop.f32.mrf.mxu1  ;;  %v568_v29 = vadd.f32 %v934_v27, %v567_v28 }
  0xb1   : >> { %v571_v31 = vpack.c.bf16 %v568_v29, %v568_v29 }
  0xb3   : >> { %v612_v33 = vsel %vm610_vm2, %v571_v31, 0 }
  0xb4   : >> { %850 = vmatmul.msk.bf16.vlgmr.msra.gmra.mxu3 %vm575_vm1, %v494_v19  ;;  %621 = vmatpush.bf16.msrb.mxu0 %v612_v33 }
  0xb6   : >> { %v569_v35 = vpop.f32.mrf.mxu2 }
 0x137   : >> { %v591_v23 = vpop.f32.mrf.mxu3 }
 0x138   : >> { %v592_v24 = vadd.f32 %v591_v23, %v573_v22 }
 0x13a   : >> { %v595_v25 = vsel %vm575_vm1, %v592_v24, -inf }
 0x13b   : >> { %596 = vmax.xlane.f32.xlu0 %v595_v25 }
 0x13f   : >> { %v593_v26 = vpop.f32.mrf.mxu3 }
 0x1ae   : >> { %v597_v30 = vpop.xlane.xlu0 %596 }
 0x1af   : >> { %v598_v32 = vsub.f32 %v592_v24, %v597_v30 }
 0x1b1   : >> { %v599_v34 = vmul.f32 1.442695, %v598_v32 }
 0x1b3   : >> { %935 = vpow2.f32 %v599_v34 }
 0x1b9   : >> { %v936_v36 = vpop.eup %935 }
 0x1ba   : >> { %v601_v37 = vsel %vm575_vm1, %v936_v36, 0.0 }
 0x1bb   : >> { %602 = vadd.xlane.f32.xlu0 %v601_v37 }
 0x22e   : >> { %v603_v40 = vpop.xlane.xlu0 %602 }
 0x22f   : >> { %937 = vrcp.f32 %v603_v40 }
 0x230   : > { %942 = vrcp.f32 (%p449_p12), %v1035_v56 }
 0x235   : >> { %v938_v41 = vpop.eup %937 }
 0x236   : >> { %v605_v42 = vmul.f32 %v938_v41, %v936_v36  ;;  %v943_v57 = vpop.eup (%p449_p12), %942 }
 0x237   : > { %v666_v58 = vmul.f32 (%p449_p12), 32.0, %v943_v57  ;;  %vm670_vm3 = vweird.f32 (%p449_p12), %v943_v57 }
 0x238   : >> { %v606_v43 = vpack.c.bf16 %v605_v42, %v605_v42 }
 0x239   : > { %v667_v59 = vsub.f32 (%p449_p12), 1.0, %v666_v58 }
 0x23a   : >> { %851 = vmatmul.msk.bf16.vlgmr.msrb.gmra.mxu0 %vm575_vm1, %v606_v43 }
 0x23b   : > { %v668_v60 = vmul.f32 (%p449_p12), %v943_v57, %v667_v59 }
 0x23d   : > { %v669_v61 = vadd.f32 (%p449_p12), %v943_v57, %v668_v60 }
 0x23f   : > { %v671_v62 = vsel (%p449_p12), %vm670_vm3, %v943_v57, %v669_v61 }
 0x2b7   : >> { %v623_v44 = vpop.f32.mrf.mxu0 }
 0x2b8   : >> { %v628_v45 = vpack.c.bf16 %v623_v44, %v623_v44 }
 0x2ba   : >> { %853 = vmatmul.msk.bf16.vlgmr.msrb.gmra.mxu1 %vm575_vm1, %v628_v45 }
 0x2bf   : >> { %v625_v46 = vpop.f32.mrf.mxu0 }
 0x337   : >> { %v647_v48 = vpop.f32.mrf.mxu1 }
 0x338   : >> { %v651_v49 = vadd.f32 %v647_v48, %v627_v47 }
 0x33a   : >> { %652 = vst.msk [vmem:[#allocation2] sm:$0xff] %vm445_vm0, %v651_v49 }
 0x33b   : > { %451 = sbr.rel (!%p449_p12) target bundleno = 31 (0x1f), region = 121 }
 0x33f   : >> { %v649_v50 = vpop.f32.mrf.mxu1 }
 0x341   : > { %v653_v51 = vld [vmem:[#allocation2] sm:$0xff] }
 0x342   : > { %v658_v53 = vadd.f32 %v939_v52, %v653_v51 }
 0x344   : > { %v659_v54 = vadd.f32 %v658_v53, %v1172_v2 }
 0x346   : > { %v662_v55 = vsel %vm445_vm0, %v659_v54, 0.0 }
 0x347   : > { %663 = vadd.xlane.f32.xlu0 %v662_v55 }
 0x3ba   : > { %v664_v63 = vpop.xlane.xlu0 %663 }
 0x3bb   : > { %v672_v0 = vmul.f32 %v671_v62, %v664_v63 }
 0x3bd   : > { %v673_v1 = vsub.f32 %v659_v54, %v672_v0 }
 0x3bf   : > { %v674_v3 = vmul.f32 %v673_v1, %v673_v1 }
 0x3c1   : > { %v675_v4 = vsel %vm445_vm0, %v674_v3, 0.0 }
 0x3c2   : > { %676 = vadd.xlane.f32.xlu0 %v675_v4 }
 0x435   : > { %v677_v2 = vpop.xlane.xlu0 %676 }
 0x436   : > { %v678_v5 = vmul.f32 %v677_v2, %v671_v62 }
 0x438   : > { %v679_v6 = vadd.f32 1e-12, %v678_v5 }
 0x43a   : > { %944 = vrsqrt.f32 %v679_v6  ;;  %vm686_vm5 = vweird.f32 %v679_v6 }
 0x440   : > { %v945_v7 = vpop.eup %944 }
 0x441   : > { %v681_v8 = vmul.f32 %v945_v7, %v679_v6  ;;  %vm687_vm4 = vweird.f32 %v945_v7 }
 0x442   : > { %vm688_vm6 = vmor %vm686_vm5, %vm687_vm4 }
 0x443   : > { %v682_v9 = vmul.f32 %v945_v7, %v681_v8 }
 0x445   : > { %v683_v10 = vmul.f32 0.5, %v682_v9 }
 0x447   : > { %v684_v11 = vsub.f32 1.5, %v683_v10 }
 0x449   : > { %v685_v12 = vmul.f32 %v945_v7, %v684_v11 }
 0x44b   : > { %v689_v14 = vsel %vm688_vm6, %v945_v7, %v685_v12 }
 0x44c   : > { %v690_v15 = vmul.f32 %v689_v14, %v673_v1 }
 0x44e   : > { %v694_v17 = vmul.f32 %v940_v13, %v690_v15 }
 0x450   : > { %v698_v18 = vadd.f32 %v941_v16, %v694_v17 }
 0x452   : > { %699 = vst.msk [vmem:[%s1315_s30] sm:$0xff] %vm445_vm0, %v698_v18 }
 0x453   : > { %973 = shalt.err (!%p970_p6)
}
 0x454   : > { %867 = dma.vmem_to_hbm [thread:$0]  (%p1141_p4), %s715_s27, 128, %s717_s28, %s701_s19  }
 0x455 PF: > { %p873_p7 = scmp.ge.s32.totalorder %s1028_s26, 2  ;;  %s728_s18 = sand.u32 1, %s1008_s21  }
 0x456   : > { %s729_s29 = scalar_lea.sflag [#allocation4], %s728_s18 }
 0x457   : > { %p870_p9 = pnand %p873_p7, %p1148_p8 }
 0x459   : > { %p871_p10 = pneg %p870_p9 }
 0x45b   : > { %1003 = dma.done.wait (%p871_p10), %s729_s29, 128  }
 0x45c   : > { %1005 = vsyncadd (%p871_p10), %s729_s29, 4294967168  ;;  %s25_s26 = sadd.s32 1, %s1028_s26   ;;  %s1317_s24 = sld [smem:[#allocation6_spill]] }
 0x45d   : > { %p22_p11 = scmp.ge.s32.totalorder %s25_s26, 4   ;;  %s1318_s23 = sld [smem:[#allocation9_spill]] }
 0x45e   : > { %s1319_s13 = sld [smem:[#allocation7_spill]]  ;;  %s1321_s21 = smov %s1012_s22 }
 0x45f   : > { %s1320_s25 = sld [smem:[#allocation8_spill]] }
 0x460   :  { %24 = sbr.rel (!%p22_p11) target bundleno = 7 (0x7), region = 132 }
 0x462   : > { %s1322_s22 = smov %s1317_s24 }
 0x464   : > { %s1323_s24 = smov %s1319_s13 }
 0x465   :  { %735 = vsyncpa [#allocation4], 1 }
 0x466   :  { %737 = vsyncpa [#allocation4 + $0x1], 1 }

</bundles_post_ra>
